<compile_context>
chip_gen: v5e
topology: v5e:2x2
jax: 0.10.0
libtpu: 0.0.40
codegen_flags: <defaults>
</compile_context>

<pallas_src>
import jax
import jax.numpy as jnp
from jax.experimental import pallas as pl
from jax.experimental.pallas import tpu as pltpu

_MAPE_EPS = 1.17e-06  # torchmetrics' epsilon
_LANES = 128


def _make_mape_kernel(n_rows: int, tr: int, n_blocks: int,
                      steps_per_core: int, acc_rows: int):
    """Kernel over one (tr, 128) row-block of the flattened (n_rows, 128) inputs.

    Accumulates per-lane partial sums of |p-t| / max(|t|, eps) into the
    resident per-core output block; the wrapper reduces and divides by n.
    """
    last_partial = (n_rows % tr) != 0  # static: only the last block has OOB rows

    def _fold_rows(err):
        # (tr, 128) f32 -> (acc_rows, 128) partial sums using plain VPU adds
        # (leading-dim reshape is free; no XLU reduce in the hot loop).
        if acc_rows == 8 and tr > 8:
            return err.reshape(tr // 8, 8, _LANES).sum(axis=0)
        return err

    def kernel(p_ref, t_ref, out_ref):
        c = pl.program_id(0)               # core axis ("parallel", 2-wide)
        i = pl.program_id(1)               # this core's reduction steps
        g = c * steps_per_core + i         # global row-block index

        @pl.when(i == 0)
        def _init():
            out_ref[...] = jnp.zeros_like(out_ref)

        def accumulate(mask_rows: bool):
            # Native-dtype (e.g. bf16) load from VMEM; cast to f32 in-register.
            p = p_ref[...].astype(jnp.float32)
            t = t_ref[...].astype(jnp.float32)
            if mask_rows:
                row = jax.lax.broadcasted_iota(jnp.int32, (tr, _LANES), 0)
                valid = (g * tr + row) < n_rows
                # select (not multiply): OOB garbage can never poison the sum
                p = jnp.where(valid, p, 0.0)
                t = jnp.where(valid, t, 0.0)
            denom = jnp.maximum(jnp.abs(t), _MAPE_EPS)
            err = jnp.abs(p - t) * pl.reciprocal(denom, approx=False)
            out_ref[0] += _fold_rows(err)

        if last_partial:
            @pl.when(g < n_blocks - 1)     # unmasked fast path for full blocks
            def _full():
                accumulate(False)

            @pl.when(g == n_blocks - 1)    # masked path only on the last block
            def _tail():
                accumulate(True)
        else:
            @pl.when(g < n_blocks)         # skip duplicated (clamped) blocks
            def _full():
                accumulate(False)

    return kernel


def mape_loss(preds, target, *, max_block_elems=512 * 1024):
    """Mean absolute percentage error of two same-shaped arrays. Returns scalar f32."""
    assert preds.shape == target.shape, (preds.shape, target.shape)
    n = int(preds.size)
    assert n > 0

    # Flatten to a sublane-dense (n_rows, 128) view. Zero-padding BOTH inputs
    # by the same <128-element tail contributes exactly 0 to the sum and is a
    # free reshape whenever n is already a multiple of 128.
    n_rows = pl.cdiv(n, _LANES)
    n_pad = n_rows * _LANES
    p_flat = preds.reshape(-1)
    t_flat = target.reshape(-1)
    if n_pad != n:
        p_flat = jnp.pad(p_flat, (0, n_pad - n))
        t_flat = jnp.pad(t_flat, (0, n_pad - n))
    p2 = p_flat.reshape(n_rows, _LANES)
    t2 = t_flat.reshape(n_rows, _LANES)

    # Row-tile: multiple of 64 sublanes (covers f32/bf16/int8 packing) unless a
    # single full-extent block already covers the whole array.
    max_rows = max(64, (max_block_elems // _LANES) // 64 * 64)
    tr = n_rows if n_rows <= max_rows else max_rows
    n_blocks = pl.cdiv(n_rows, tr)
    steps_per_core = pl.cdiv(n_blocks, 2)        # 2 TensorCores on v7x
    acc_rows = 8 if tr % 8 == 0 else tr          # per-lane accumulator rows

    if 2 * steps_per_core == n_blocks:
        def row_block(c, i):                     # even split: plain affine map
            return (c * steps_per_core + i, 0)
    else:
        def row_block(c, i):                     # odd: clamp core 1's dup block
            return (jnp.minimum(c * steps_per_core + i, n_blocks - 1), 0)

    out = pl.pallas_call(
        _make_mape_kernel(n_rows, tr, n_blocks, steps_per_core, acc_rows),
        out_shape=jax.ShapeDtypeStruct((2, acc_rows, _LANES), jnp.float32),
        grid_spec=pltpu.PrefetchScalarGridSpec(
            num_scalar_prefetch=0,
            grid=(2, steps_per_core),
            in_specs=[
                pl.BlockSpec((tr, _LANES), row_block),
                pl.BlockSpec((tr, _LANES), row_block),
            ],
            out_specs=pl.BlockSpec((1, acc_rows, _LANES), lambda c, i: (c, 0, 0)),
        ),
        compiler_params=pltpu.CompilerParams(
            dimension_semantics=("parallel", "arbitrary"),
            vmem_limit_bytes=32 * 1024 * 1024,
        ),
    )(p2, t2)

    # Single cross-lane reduce + static element count -> finish in the wrapper.
    return jnp.sum(out) / jnp.float32(n)


def _reference(preds, target):
    """Pure-JAX reference of torchmetrics mean_absolute_percentage_error."""
    p = preds.reshape(-1).astype(jnp.float32)
    t = target.reshape(-1).astype(jnp.float32)
    return jnp.mean(jnp.abs(p - t) / jnp.maximum(jnp.abs(t), _MAPE_EPS))


if __name__ == "__main__":
    # MAPELoss has no learnable parameters -> nothing to initialize.
    key = jax.random.PRNGKey(0)
    k1, k2, k3, k4, k5, k6 = jax.random.split(key, 6)

    # Case 1: typical Ludwig number-feature shape — a 1-D batch of predictions
    # (single partial row, single block, odd block count -> clamped index map).
    B = 16
    preds = jax.random.normal(k1, (B,), dtype=jnp.float32) * 2.0 + 3.0
    target = jax.random.uniform(k2, (B,), dtype=jnp.float32, minval=1.0, maxval=4.0)
    loss = jax.block_until_ready(mape_loss(preds, target))
    ref = _reference(preds, target)
    assert jnp.allclose(loss, ref, atol=1e-5, rtol=1e-5), (loss, ref)

    # Case 2: bf16 multi-dim input, 2 row-blocks (one per core on v7x) with a
    # masked ragged tail row-block and a <128-lane zero-padded column tail.
    preds2 = (jax.random.normal(k3, (5, 1700)) * 0.5 + 2.0).astype(jnp.bfloat16)
    target2 = jax.random.uniform(k4, (5, 1700), minval=0.5, maxval=3.0).astype(jnp.bfloat16)
    loss2 = jax.block_until_ready(mape_loss(preds2, target2, max_block_elems=64 * 128))
    ref2 = _reference(preds2, target2)
    assert jnp.allclose(loss2, ref2, atol=1e-4, rtol=1e-4), (loss2, ref2)

    # Case 3: f32, exactly divisible (no padding, no masking, even block count).
    preds3 = jax.random.normal(k5, (64, 256), dtype=jnp.float32) + 2.0
    target3 = jax.random.uniform(k6, (64, 256), dtype=jnp.float32, minval=0.5, maxval=3.0)
    loss3 = jax.block_until_ready(mape_loss(preds3, target3, max_block_elems=64 * 128))
    ref3 = _reference(preds3, target3)
    assert jnp.allclose(loss3, ref3, atol=2e-5, rtol=2e-5), (loss3, ref3)

    print("KERNEL_OK")
</pallas_src>

<mosaic_0001>
module attributes {stable_mosaic.version = 11 : i64} {
  func.func @kernel(%arg0: i32, %arg1: i32, %arg2: memref<1x128xf32, #tpu.memory_space<vmem>>, %arg3: memref<1x128xf32, #tpu.memory_space<vmem>>, %arg4: memref<1x1x128xf32, #tpu.memory_space<vmem>>) attributes {dimension_semantics = [#tpu.dimension_semantics<parallel>, #tpu.dimension_semantics<arbitrary>], iteration_bounds = array<i64: 2, 1>, scalar_prefetch = 0 : i64, scratch_operands = 0 : i64, tpu.core_type = #tpu.core_type<tc>, window_params = [{transform_indices = @transform_0, window_bounds = array<i64: 1, 128>}, {transform_indices = @transform_1, window_bounds = array<i64: 1, 128>}, {transform_indices = @transform_2, window_bounds = array<i64: 1, 1, 128>}]} {
    %c1_i32 = arith.constant 1 : i32
    %0 = arith.muli %arg0, %c1_i32 : i32
    %1 = arith.addi %0, %arg1 : i32
    %c0_i32 = arith.constant 0 : i32
    %2 = arith.cmpi eq, %arg1, %c0_i32 : i32
    %3 = arith.extui %2 : i1 to i32
    %c0_i32_0 = arith.constant 0 : i32
    %4 = arith.cmpi ne, %3, %c0_i32_0 : i32
    scf.if %4 {
      %cst = arith.constant 0.000000e+00 : f32
      %8 = vector.broadcast %cst : f32 to vector<1x1x128xf32>
      %c0 = arith.constant 0 : index
      %c0_3 = arith.constant 0 : index
      %c0_4 = arith.constant 0 : index
      %9 = vector.load %arg4[%c0, %c0_3, %c0_4] : memref<1x1x128xf32, #tpu.memory_space<vmem>>, vector<1x1x128xf32>
      tpu.vector_store %arg4[%c0, %c0_3, %c0_4], %8 {strides = array<i32>} : memref<1x1x128xf32, #tpu.memory_space<vmem>>, vector<1x1x128xf32>,
    } else {
    }
    %c1_i32_1 = arith.constant 1 : i32
    %5 = arith.cmpi slt, %1, %c1_i32_1 : i32
    %6 = arith.extui %5 : i1 to i32
    %c0_i32_2 = arith.constant 0 : i32
    %7 = arith.cmpi ne, %6, %c0_i32_2 : i32
    scf.if %7 {
      %c0 = arith.constant 0 : index
      %c0_3 = arith.constant 0 : index
      %8 = vector.load %arg2[%c0, %c0_3] : memref<1x128xf32, #tpu.memory_space<vmem>>, vector<1x128xf32>
      %c0_4 = arith.constant 0 : index
      %c0_5 = arith.constant 0 : index
      %9 = vector.load %arg3[%c0_4, %c0_5] : memref<1x128xf32, #tpu.memory_space<vmem>>, vector<1x128xf32>
      %10 = math.absf %9 : vector<1x128xf32>
      %cst = arith.constant 1.170000e-06 : f32
      %11 = vector.broadcast %cst : f32 to vector<1x128xf32>
      %12 = arith.maximumf %10, %11 : vector<1x128xf32>
      %13 = arith.subf %8, %9 : vector<1x128xf32>
      %14 = math.absf %13 : vector<1x128xf32>
      %15 = tpu.reciprocal %12 : vector<1x128xf32> -> vector<1x128xf32>
      %16 = arith.mulf %14, %15 : vector<1x128xf32>
      %c0_6 = arith.constant 0 : index
      %c0_7 = arith.constant 0 : index
      %c0_8 = arith.constant 0 : index
      %17 = vector.load %arg4[%c0_6, %c0_7, %c0_8] : memref<1x1x128xf32, #tpu.memory_space<vmem>>, vector<1x1x128xf32>
      %18 = vector.shape_cast %17 : vector<1x1x128xf32> to vector<1x128xf32>
      %19 = arith.addf %18, %16 : vector<1x128xf32>
      %c0_9 = arith.constant 0 : index
      %c0_10 = arith.constant 0 : index
      %c0_11 = arith.constant 0 : index
      %20 = vector.load %arg4[%c0_9, %c0_10, %c0_11] : memref<1x1x128xf32, #tpu.memory_space<vmem>>, vector<1x1x128xf32>
      %21 = vector.shape_cast %20 : vector<1x1x128xf32> to vector<1x128xf32>
      %22 = vector.shape_cast %19 : vector<1x128xf32> to vector<1x1x128xf32>
      tpu.vector_store %arg4[%c0_9, %c0_10, %c0_11], %22 {strides = array<i32>} : memref<1x1x128xf32, #tpu.memory_space<vmem>>, vector<1x1x128xf32>,
    } else {
    }
    return
  }
  func.func @transform_0(%arg0: i32, %arg1: i32) -> (i32, i32) {
    %c1_i32 = arith.constant 1 : i32
    %0 = arith.muli %arg0, %c1_i32 : i32
    %1 = arith.addi %0, %arg1 : i32
    %c0_i32 = arith.constant 0 : i32
    %2 = arith.minsi %1, %c0_i32 : i32
    %c0_i32_0 = arith.constant 0 : i32
    %c0_i32_1 = arith.constant 0 : i32
    return %2, %c0_i32_0 : i32, i32
  }
  func.func @transform_1(%arg0: i32, %arg1: i32) -> (i32, i32) {
    %c1_i32 = arith.constant 1 : i32
    %0 = arith.muli %arg0, %c1_i32 : i32
    %1 = arith.addi %0, %arg1 : i32
    %c0_i32 = arith.constant 0 : i32
    %2 = arith.minsi %1, %c0_i32 : i32
    %c0_i32_0 = arith.constant 0 : i32
    %c0_i32_1 = arith.constant 0 : i32
    return %2, %c0_i32_0 : i32, i32
  }
  func.func @transform_2(%arg0: i32, %arg1: i32) -> (i32, i32, i32) {
    %c0_i32 = arith.constant 0 : i32
    %c0_i32_0 = arith.constant 0 : i32
    %c0_i32_1 = arith.constant 0 : i32
    return %arg0, %c0_i32, %c0_i32_0 : i32, i32, i32
  }
}

</mosaic_0001>

<bundles_post_ra>
// kernel: tpu_custom_call.1
= control target key start
LH: loop header
LB: loop body
LE: loop exit
PB: predicated region body
PF: predicated region fallthrough
CT: control target
= control target key end

     0   :  { %7 = vsyncpa [#allocation3], 0  ;;  %s831_s0 = inlined_call_operand.hbm [shape: f32[1,128], index: 0, kind: input, shape index: {}]   ;;  %s832_s1 = inlined_call_operand.hbm [shape: f32[1,128], index: 1, kind: input, shape index: {}]   ;;  %s833_s2 = inlined_call_operand.hbm [shape: f32[2,1,128], index: 2, kind: output, shape index: {}]  }
   0x1   :  { %9 = vsyncpa [#allocation3 + $0x1], 0 }
   0x2   :  { %10 = vsyncpa [#allocation6], 0 }
   0x3   :  { %12 = vsyncpa [#allocation6 + $0x1], 0 }
   0x4   :  { %13 = vsyncpa [#allocation4], 0 }
   0x5   :  { %15 = vsyncpa [#allocation4 + $0x1], 0  ;;  %s652_s9 = smov 0   ;;  %s654_s10 = smov 0  }
   0x6   :  { %s656_s11 = smov 0   ;;  %s658_s12 = smov 0  }
   0x7   :  { %s660_s13 = smov 0   ;;  %s662_s14 = smov 0  }
   0x8   :  { %s664_s15 = smov 0   ;;  %s666_s16 = smov 0  }
   0x9 LB: > { %s363_s17 = sadd.s32 4294967295, %s632_s16   ;;  %s364_s18 = sadd.s32 4294967294, %s632_s16   ;;  %s632_s16 = sphi %s666_s16, %s21_s16   ;;  %s628_s15 = sphi %s664_s15, %s845_s15   ;;  %s624_s14 = sphi %s662_s14, %s844_s14   ;;  %s620_s13 = sphi %s660_s13, %s821_s13   ;;  %s616_s12 = sphi %s658_s12, %s843_s12   ;;  %s612_s11 = sphi %s656_s11, %s842_s11   ;;  %s608_s10 = sphi %s654_s10, %s841_s10   ;;  %s604_s9 = sphi %s652_s9, %s840_s9  }
   0xa   : > { %s33_s19 = sadd.s32 1, %s628_s15  ;;  %p601_p1 = scmp.ne.s32.totalorder %s620_s13, 0 }
   0xb   : > { %p35_p0 = scmp.ge.s32.totalorder %s33_s19, 2  ;;  %p54_p2 = scmp.eq.s32.totalorder %s632_s16, 0 }
   0xc   : > { %p59_p3 = scmp.ne.s32.totalorder %s620_s13, %s616_s12  ;;  %p60_p5 = scmp.eq.s32.totalorder %s363_s17, 0 }
   0xd   : > { %s847_s19 = smov (%p35_p0, %s33_s19), 0  ;;  %p698_p4 = por %p601_p1, %p54_p2 }
   0xe   : > { %p702_p6 = por %p60_p5, %p59_p3  ;;  %s101_s22 = ssub.s32 %s628_s15, %s847_s19 }
   0xf   : > { %p102_p7 = scmp.eq.s32.totalorder %s101_s22, 0  ;;  %s104_s23 = sadd.s32 1, %s612_s11 }
  0x10   : > { %p114_p8 = scmp.ne.s32.totalorder %s612_s11, %s608_s10  ;;  %p115_p9 = scmp.eq.s32.totalorder %s363_s17, 1 }
  0x11   : > { %s710_s24 = scalar_select %p102_p7, %s612_s11, %s104_s23  }
  0x12   : > { %p120_p10 = scmp.ne.s32.totalorder %s608_s10, %s604_s9  ;;  %p121_p11 = scmp.eq.s32.totalorder %s364_s18, 1 }
  0x13   : > { %p716_p12 = por %p115_p9, %p114_p8  ;;  %p366_p13 = scmp.ge.s32.totalorder %s632_s16, 2 }
  0x14   : > { %p721_p0 = por %p121_p11, %p120_p10  ;;  %p388_p1 = scmp.lt.s32.totalorder %s632_s16, 2 }
  0x15   : > { %s152_s29 = sshll.u32 %s831_s0, 4  ;;  %s634_s30 = smov [#allocation2]   ;;  %s153_s29 = int_to_ptr.hbm [resolvable:$true] %s152_s29 }
  0x16   : > { %s154_s3 = sshll.u32 %s634_s30, 4  ;;  %p731_p2 = pnand %p388_p1, %p698_p4  ;;  %s155_s3 = int_to_ptr.vmem [resolvable:$true] %s154_s3 }
  0x17   : > { %p367_p3 = scmp.ge.s32.totalorder %s632_s16, 1  ;;  %p179_p5 = scmp.lt.s32.totalorder %s632_s16, 3 }
  0x18   : > { %s465_s5 = sshra.s32 %s153_s29, 4  ;;  %p469_p8 = pneg %p731_p2  ;;  %s466_s5 = int_to_ptr.hbm [resolvable:$true] %s465_s5 }
  0x19   : > { %s467_s6 = scalar_lea.hbm %s466_s5, 1  ;;  %s472_s12 = scalar_lea.hbm %s831_s0, 1 }
  0x1a   : > { %p468_p7 = scmp.ne.s32.totalorder %s466_s5, %s467_s6  ;;  %p474_p4 = scmp.lt.s32.totalorder %s472_s12, %s467_s6 }
  0x1c   : > { %p470_p9 = pnand %p469_p8, %p468_p7 }
  0x1e   : > { %p471_p10 = pneg %p470_p9 }
  0x20   : > { %p476_p11 = pnand %p474_p4, %p471_p10 }
  0x22   : > { %479 = shalt.err (!%p476_p11)
}
  0x23   : > { %380 = dma.hbm_to_vmem [thread:$0]  (!%p731_p2), %s153_s29, 16, %s155_s3, [#allocation3]  }
  0x24   : > { %p751_p1 = pnand %p367_p3, %p179_p5  ;;  %s172_s22 = sshll.u32 %s832_s1, 4  ;;  %s173_s22 = int_to_ptr.hbm [resolvable:$true] %s172_s22 }
  0x25   : > { %s635_s23 = smov [#allocation5]   ;;  %s495_s28 = sshra.s32 %s173_s22, 4  ;;  %s496_s28 = int_to_ptr.hbm [resolvable:$true] %s495_s28 }
  0x26   : > { %s174_s27 = sshll.u32 %s635_s23, 4  ;;  %s497_s30 = scalar_lea.hbm %s496_s28, 1  ;;  %s175_s27 = int_to_ptr.vmem [resolvable:$true] %s174_s27 }
  0x27   : > { %p498_p7 = scmp.ne.s32.totalorder %s496_s28, %s497_s30  ;;  %s502_s5 = scalar_lea.hbm %s832_s1, 1 }
  0x28   : > { %p504_p3 = scmp.lt.s32.totalorder %s502_s5, %s497_s30 }
  0x29   : > { %p500_p9 = pnand %p498_p7, %p469_p8 }
  0x2b   : > { %p501_p10 = pneg %p500_p9 }
  0x2d   : > { %p506_p5 = pnand %p504_p3, %p501_p10 }
  0x2f   : > { %509 = shalt.err (!%p506_p5)
}
  0x30   : > { %383 = dma.hbm_to_vmem [thread:$0]  (!%p731_p2), %s173_s22, 16, %s175_s27, [#allocation6]  }
  0x31   : > { %183 = sbr.rel (%p751_p1) target bundleno = 105 (0x69), region = 28  ;;  %s185_s6 = sand.u32 (!%p751_p1), 1, %s620_s13  }
  0x32   : > { %s186_s7 = scalar_lea.sflag (!%p751_p1), [#allocation3], %s185_s6  ;;  %s188_s8 = scalar_lea.vmem (!%p751_p1), [#allocation2], %s185_s6 }
  0x36   : > { %590 = dma.done.wait (%p702_p6), %s186_s7, 16  }
  0x37   : > { %592 = vsyncadd (%p702_p6), %s186_s7, 4294967280  ;;  %s195_s12 = scalar_lea.sflag [#allocation6], %s185_s6  ;;  %s197_s18 = scalar_lea.vmem [#allocation5], %s185_s6 }
  0x38   : > { %594 = dma.done.wait (%p702_p6), %s195_s12, 16  }
  0x39   : > { %596 = vsyncadd (%p702_p6), %s195_s12, 4294967280  ;;  %s219_s4 = sand.u32 1, %s608_s10   ;;  %v636_v0 = vmov 0.0   ;;  %p368_p2 = scmp.ge.s32.totalorder %s624_s14, 1 }
  0x3a   : > { %s780_s17 = scalar_lea.vmem [#allocation7], %s219_s4 }
  0x3b   : > { %232 = vst [vmem:[%s780_s17] sm:$0x1] %v636_v0  ;;  %236 = sbr.rel (%p368_p2) target bundleno = 91 (0x5b), region = 44 }
  0x40   : > { %v238_v1 = vld [vmem:[%s197_s18] sm:$0x1] }
  0x41   : > { %v239_v2 = vand.u32 2147483647, %v238_v1  ;;  %v237_v4 = vld [vmem:[%s188_s8] sm:$0x1] }
  0x42   : > { %v241_v7 = vsub.f32 %v237_v4, %v238_v1  ;;  %v258_v17 = vld [vmem:[%s780_s17] sm:$0x1] }
  0x43   : > { %v240_v3 = vmax.f32 %v239_v2, 1.17e-06 }
  0x44   : > { %v242_v13 = vand.u32 2147483647, %v241_v7 }
  0x45   : > { %463 = vrcp.f32 %v240_v3  ;;  %v254_v8 = vand.u32 2147483648, %v240_v3  ;;  %vm248_vm0 = vweird.f32 %v240_v3  ;;  %v252_v10 = vand.u32 2147483647, %v240_v3 }
  0x47   : > { %v255_v12 = vor.u32 1.1754944e-38, %v254_v8  ;;  %vm253_vm3 = vcmp.eq.f32.partialorder %v252_v10, 8.507059e+37 }
  0x4b   : > { %v464_v5 = vpop.eup %463 }
  0x4c   : > { %v244_v6 = vmul.f32 %v464_v5, %v240_v3  ;;  %vm249_vm1 = vweird.f32 %v464_v5 }
  0x4d   : > { %vm250_vm2 = vmor %vm248_vm0, %vm249_vm1 }
  0x4e   : > { %v245_v9 = vsub.f32 1.0, %v244_v6 }
  0x50   : > { %v246_v11 = vmul.f32 %v464_v5, %v245_v9 }
  0x52   : > { %v247_v14 = vadd.f32 %v464_v5, %v246_v11 }
  0x54   : > { %v251_v15 = vsel %vm250_vm2, %v464_v5, %v247_v14 }
  0x55   : > { %v256_v16 = vsel %vm253_vm3, %v255_v12, %v251_v15 }
  0x56   : > { %v257_v18 = vmul.f32 %v256_v16, %v242_v13 }
  0x58   : > { %v259_v19 = vadd.f32 %v258_v17, %v257_v18 }
  0x5a   : > { %260 = vst [vmem:[%s780_s17] sm:$0x1] %v259_v19 }
  0x5b PF: > { %s270_s22 = scalar_lea.hbm %s833_s2, %s624_s14  ;;  %s272_s23 = sshll.u32 %s780_s17, 4  ;;  %s273_s23 = int_to_ptr.vmem [resolvable:$true] %s272_s23 }
  0x5c   : > { %s274_s27 = sshll.u32 %s270_s22, 4  ;;  %s262_s28 = scalar_lea.sflag [#allocation4], %s219_s4  ;;  %s275_s27 = int_to_ptr.hbm [resolvable:$true] %s274_s27 }
  0x5d   : > { %s539_s30 = sshra.s32 %s275_s27, 4  ;;  %s545_s6 = scalar_lea.hbm %s833_s2, 2  ;;  %s540_s30 = int_to_ptr.hbm [resolvable:$true] %s539_s30 }
  0x5e   : > { %s541_s29 = scalar_lea.hbm %s540_s30, 1  ;;  %p546_p11 = scmp.lt.s32.totalorder %s540_s30, %s833_s2 }
  0x5f   : > { %p542_p6 = scmp.ne.s32.totalorder %s540_s30, %s541_s29  ;;  %p547_p1 = scmp.lt.s32.totalorder %s545_s6, %s541_s29 }
  0x61   : > { %p543_p8 = pnand %p542_p6, %p716_p12  ;;  %p548_p7 = por %p547_p1, %p546_p11 }
  0x63   : > { %p544_p4 = pneg %p543_p8 }
  0x65   : > { %p549_p9 = pnand %p548_p7, %p544_p4 }
  0x67   : > { %552 = shalt.err (!%p549_p9)
}
  0x68   : > { %375 = dma.vmem_to_hbm [thread:$0]  (%p716_p12), %s273_s23, 16, %s275_s27, %s262_s28  }
  0x69 PF: > { %s286_s14 = sand.u32 1, %s604_s9   ;;  %p385_p10 = pnand %p366_p13, %p721_p0 }
  0x6a   : > { %s287_s12 = scalar_lea.sflag [#allocation4], %s286_s14 }
  0x6b   : > { %p386_p3 = pneg %p385_p10 }
  0x6d   : > { %598 = dma.done.wait (%p386_p3), %s287_s12, 16  }
  0x6e   : > { %600 = vsyncadd (%p386_p3), %s287_s12, 4294967280  ;;  %s21_s16 = sadd.s32 1, %s632_s16   ;;  %s840_s9 = smov %s608_s10 }
  0x6f   : > { %p18_p5 = scmp.ge.s32.totalorder %s21_s16, 4   ;;  %s841_s10 = smov %s612_s11 }
  0x70   : > { %s842_s11 = smov %s710_s24  ;;  %s843_s12 = smov %s620_s13 }
  0x71   : > { %s821_s13 = smov 0   ;;  %s844_s14 = smov %s628_s15 }
  0x72   : > { %s845_s15 = smov %s847_s19  ;;  %20 = sbr.rel (!%p18_p5) target bundleno = 9 (0x9), region = 94 }
  0x77   :  { %292 = vsyncpa [#allocation3], 1 }
  0x78   :  { %294 = vsyncpa [#allocation3 + $0x1], 1 }
  0x79   :  { %295 = vsyncpa [#allocation6], 1 }
  0x7a   :  { %297 = vsyncpa [#allocation6 + $0x1], 1 }
  0x7b   :  { %298 = vsyncpa [#allocation4], 1 }
  0x7c   :  { %300 = vsyncpa [#allocation4 + $0x1], 1 }

</bundles_post_ra>
